<compile_context>
chip_gen: v5e
topology: v5e:2x2
jax: 0.10.0
libtpu: 0.0.40
codegen_flags: <defaults>
</compile_context>

<pallas_src>
import jax
import jax.numpy as jnp
from jax.experimental import pallas as pl
from jax.experimental.pallas import tpu as pltpu

LANES = 128


def _scale_kernel(scale_ref, x_ref, o_ref):
    # scale_ref is an fp32 scalar in SMEM; x_ref/o_ref are VMEM tiles.
    # Multiply in (at least) f32, then cast the product to the output dtype.
    o_ref[...] = (x_ref[...] * scale_ref[0]).astype(o_ref.dtype)


def scale_forward(x: jax.Array, scale: jax.Array, *, tile_rows: int = 2048) -> jax.Array:
    """Elementwise x * scale using a Pallas TPU kernel.

    x:     any-shaped float array (e.g. NCHW [B, C, H, W])
    scale: shape (1,) float array (the learnable scalar parameter, kept fp32)
    """
    orig_shape = x.shape
    orig_dtype = x.dtype

    flat = x.reshape(-1)  # free (contiguous) reshape
    n = flat.shape[0]

    # Pad only to a multiple of LANES (<= 127 elements). For typical NCHW
    # feature maps this is a no-op, so there is no extra HBM pass.
    pad = (-n) % LANES
    if pad:
        flat = jnp.pad(flat, (0, pad))
    rows = flat.shape[0] // LANES
    x2d = flat.reshape(rows, LANES)

    # Block rows: as large as requested but never bigger than the (8-rounded)
    # row count; block_shape stays divisible by (8, 128).
    eff_rows = min(tile_rows, ((rows + 7) // 8) * 8)
    grid = (pl.cdiv(rows, eff_rows),)  # ragged last block handled by Pallas masking

    out2d = pl.pallas_call(
        _scale_kernel,
        out_shape=jax.ShapeDtypeStruct((rows, LANES), orig_dtype),
        grid_spec=pltpu.PrefetchScalarGridSpec(
            num_scalar_prefetch=0,
            grid=grid,
            in_specs=[
                pl.BlockSpec(memory_space=pltpu.MemorySpace.SMEM),   # fp32 scale scalar
                pl.BlockSpec((eff_rows, LANES), lambda i: (i, 0)),   # x tile
            ],
            out_specs=pl.BlockSpec((eff_rows, LANES), lambda i: (i, 0)),
        ),
        compiler_params=pltpu.CompilerParams(
            dimension_semantics=("parallel",),  # shards the loop across v7x's 2 TCs
        ),
    )(scale.astype(jnp.float32), x2d)

    out = out2d.reshape(-1)
    if pad:
        out = out[:n]
    return out.reshape(orig_shape)


if __name__ == "__main__":
    key = jax.random.PRNGKey(0)

    # Deterministic parameter init (matches nn.Parameter(torch.FloatTensor([0.001])))
    init_value = 0.001
    scale_param = jnp.array([init_value], dtype=jnp.float32)

    # Small example input consistent with an NCHW attention feature map.
    x = jax.random.normal(key, (2, 4, 16, 16), dtype=jnp.float32)

    out = scale_forward(x, scale_param)
    out = jax.block_until_ready(out)

    # Sanity check against the trivial reference.
    ref = x * scale_param[0]
    assert out.shape == x.shape and out.dtype == x.dtype
    assert jnp.allclose(out, ref, atol=1e-6, rtol=1e-6)

    print("KERNEL_OK")
</pallas_src>

<mosaic_0001>
module attributes {stable_mosaic.version = 11 : i64} {
  func.func @_scale_kernel(%arg0: i32, %arg1: memref<1xf32, #tpu.memory_space<smem>>, %arg2: memref<16x128xf32, #tpu.memory_space<vmem>>, %arg3: memref<16x128xf32, #tpu.memory_space<vmem>>) attributes {dimension_semantics = [#tpu.dimension_semantics<parallel>], iteration_bounds = array<i64: 1>, scalar_prefetch = 0 : i64, scratch_operands = 0 : i64, tpu.core_type = #tpu.core_type<tc>, window_params = [{transform_indices = @transform_0, window_bounds = array<i64: 1>}, {transform_indices = @transform_1, window_bounds = array<i64: 16, 128>}, {transform_indices = @transform_2, window_bounds = array<i64: 16, 128>}]} {
    %c0 = arith.constant 0 : index
    %c0_0 = arith.constant 0 : index
    %0 = vector.load %arg2[%c0, %c0_0] : memref<16x128xf32, #tpu.memory_space<vmem>>, vector<16x128xf32>
    %c0_1 = arith.constant 0 : index
    %1 = memref.load %arg1[%c0_1] : memref<1xf32, #tpu.memory_space<smem>>
    %2 = vector.broadcast %1 : f32 to vector<16x128xf32>
    %3 = arith.mulf %0, %2 : vector<16x128xf32>
    %c0_2 = arith.constant 0 : index
    %c0_3 = arith.constant 0 : index
    %4 = vector.load %arg3[%c0_2, %c0_3] : memref<16x128xf32, #tpu.memory_space<vmem>>, vector<16x128xf32>
    tpu.vector_store %arg3[%c0_2, %c0_3], %3 {strides = array<i32>} : memref<16x128xf32, #tpu.memory_space<vmem>>, vector<16x128xf32>,
    return
  }
  func.func @transform_0(%arg0: i32) -> i32 {
    %c0_i32 = arith.constant 0 : i32
    %c0_i32_0 = arith.constant 0 : i32
    return %c0_i32 : i32
  }
  func.func @transform_1(%arg0: i32) -> (i32, i32) {
    %c0_i32 = arith.constant 0 : i32
    %c0_i32_0 = arith.constant 0 : i32
    return %arg0, %c0_i32 : i32, i32
  }
  func.func @transform_2(%arg0: i32) -> (i32, i32) {
    %c0_i32 = arith.constant 0 : i32
    %c0_i32_0 = arith.constant 0 : i32
    return %arg0, %c0_i32 : i32, i32
  }
}

</mosaic_0001>

<bundles_post_ra>
// kernel: tpu_custom_call.1
= control target key start
LH: loop header
LB: loop body
LE: loop exit
PB: predicated region body
PF: predicated region fallthrough
CT: control target
= control target key end

     0   :  { %8 = vsyncpa [#allocation4], 0  ;;  %s140_s0 = inlined_call_operand.<no memory space> [shape: f32[1], index: 0, kind: input, shape index: {}]   ;;  %s141_s1 = inlined_call_operand.hbm [shape: f32[16,128], index: 1, kind: input, shape index: {}]   ;;  %s142_s2 = inlined_call_operand.hbm [shape: f32[16,128], index: 2, kind: output, shape index: {}]  }
   0x1   :  { %9 = vsyncpa [#allocation5], 0  ;;  %s16_s11 = sshll.u32 %s141_s1, 4  ;;  %s112_s12 = smov [#allocation3]   ;;  %s17_s11 = int_to_ptr.hbm [resolvable:$true] %s16_s11 }
   0x2   :  { %s18_s13 = sshll.u32 %s112_s12, 4  ;;  %s113_s14 = smov 128   ;;  %s19_s13 = int_to_ptr.vmem [resolvable:$true] %s18_s13 }
   0x3   :  { %s114_s15 = smov 8  }
   0x4   :  { %24 = dma.hbm_to_vmem [thread:$0]  %s17_s11, 256, %s19_s13, [#allocation4], %s113_s14, %s113_s14, %s114_s15  }
   0x5   :  { %108 = dma.done.wait [#allocation4], 256  }
   0x6   :  { %109 = vsyncadd [#allocation4], 4294967040  ;;  %v32_v0 = vstv %s140_s0  ;;  %s115_s18 = smov [#allocation6]   ;;  %s43_s22 = sshll.u32 %s142_s2, 4  ;;  %v29_v1 = vld [vmem:[#allocation3] sm:$0xff]  ;;  %v30_v2 = vld [vmem:[#allocation3 + $0x8] sm:$0xff]  ;;  %s44_s22 = int_to_ptr.hbm [resolvable:$true] %s43_s22 }
   0x7   :  { %s41_s19 = sshll.u32 %s115_s18, 4  ;;  %v33_v3 = vmul.f32 %v32_v0, %v29_v1  ;;  %v34_v4 = vmul.f32 %v32_v0, %v30_v2  ;;  %s42_s19 = int_to_ptr.vmem [resolvable:$true] %s41_s19 }
   0x9   :  { %35 = vst [vmem:[#allocation6] sm:$0xff] %v33_v3 }
   0xa   :  { %36 = vst [vmem:[#allocation6 + $0x8] sm:$0xff] %v34_v4 }
   0xb   :  { %49 = dma.vmem_to_hbm [thread:$0]  %s42_s19, 256, %s44_s22, [#allocation5], %s113_s14, %s113_s14, %s114_s15  }
   0xc   :  { %110 = dma.done.wait [#allocation5], 256  }
   0xd   :  { %111 = vsyncadd [#allocation5], 4294967040 }
   0xe   :  { %54 = vsyncpa [#allocation4], 1 }
   0xf   :  { %55 = vsyncpa [#allocation5], 1 }

</bundles_post_ra>
